<compile_context>
chip_gen: v6e
topology: v6e:2x2x1
jax: 0.10.0
libtpu: 0.0.40
codegen_flags: <defaults>
</compile_context>

<pallas_src>
import math

import jax
import jax.numpy as jnp
from jax.experimental import pallas as pl
from jax.experimental.pallas import tpu as pltpu


_LOG_2PI = math.log(2.0 * math.pi)
_EPS = 1e-8
_LANES = 128                      # lane-dense last dim
_PALLAS_MIN_ELEMENTS = 1 << 20    # below this, XLA fuses the reduce just fine


def _round_up(x, m):
    return ((x + m - 1) // m) * m


def _cdiv(a, b):
    return -(-a // b)


def _sublane_tile(dtype):
    # Packed sublane tile: 8 for 32-bit, 16 for 16-bit, 32 for 8-bit dtypes.
    return max(8, 32 // jnp.dtype(dtype).itemsize)


def _default_max_block_rows():
    # v7x HBM (~3.2 TB/s) makes the ~0.35us per-grid-step overhead visible at
    # 4096-row blocks; 8192-row (4 MiB f32) blocks halve it and still fit the
    # 64 MiB VMEM. v5e/v6e are already at the roofline plateau at 4096.
    try:
        kind = jax.devices()[0].device_kind.lower()
    except Exception:
        kind = ""
    return 8192 if "v7" in kind else 4096


def _make_kernel(acc_rows, block_rows):
    """Build the accumulate kernel for a given (static) block / acc shape."""
    fold = acc_rows != block_rows

    def kernel(pm_ref, pls_ref, qm_ref, out_ref, acc_ref):
        j = pl.program_id(1)

        @pl.when(j == 0)
        def _():
            acc_ref[...] = jnp.zeros_like(acc_ref)

        # 2x the constant-free Normal log-prob:
        #   u - diff^2 * exp(u),  u = -2*logstd,  diff = (targets + eps) - mean
        x = qm_ref[...].astype(jnp.float32) + _EPS
        mu = pm_ref[...].astype(jnp.float32)
        u = -2.0 * pls_ref[...].astype(jnp.float32)
        diff = x - mu
        term = u - diff * diff * jnp.exp(u)

        if fold:
            # Fold the two block halves (static, tile-aligned slices) before
            # the accumulate: halves acc RMW traffic and acc VMEM.
            acc_ref[...] += term[:acc_rows] + term[acc_rows:]
        else:
            acc_ref[...] += term

        @pl.when(j == pl.num_programs(1) - 1)
        def _():
            out_ref[0, 0] = jnp.sum(acc_ref[...])

    return kernel


def _reference(prior_mean, prior_logstd, post_mean, data_shape):
    """Pure-JAX reference mirroring the PyTorch module (also small-N path)."""
    B = prior_mean.shape[0]
    x = post_mean.astype(jnp.float32) + _EPS
    mu = prior_mean.astype(jnp.float32)
    logstd = prior_logstd.astype(jnp.float32)
    lp = -0.5 * (x - mu) ** 2 * jnp.exp(-2.0 * logstd) - logstd - 0.5 * _LOG_2PI
    per_example = jnp.sum(lp.reshape(B, -1), axis=1)
    scalar = B * float(math.prod(data_shape))
    return jnp.sum(per_example) / jnp.float32(scalar * math.log(2.0))


def logprob_kl_divergence(prior_mean, prior_logstd, post_mean, data_shape, *,
                          force_pallas=False, max_block_rows=None):
    """Pallas implementation of LogProbKLDivergence.forward (with_stats=False).

    prior_mean, prior_logstd, post_mean: (B, C, H, W) (any floating dtype).
    data_shape: tuple used only for the normalization scalar.
    Returns a scalar f32 loss.
    """
    shape = prior_mean.shape
    B = shape[0]
    N = int(math.prod(shape))

    if not force_pallas and N < _PALLAS_MIN_ELEMENTS:
        # Small latents: fixed pallas_call + pad/reshape overhead dominates.
        return _reference(prior_mean, prior_logstd, post_mean, data_shape)

    if max_block_rows is None:
        max_block_rows = _default_max_block_rows()

    tile = max(_sublane_tile(prior_mean.dtype),
               _sublane_tile(prior_logstd.dtype),
               _sublane_tile(post_mean.dtype))
    max_block_rows = max(_round_up(max_block_rows, tile), tile)

    # Minimal, block-divisible padding: pad rows to the dtype tile, choose the
    # block divisor from that, and only then pad to the (tile-rounded) cover.
    rows = _round_up(_cdiv(N, _LANES), tile)
    num_blocks = _cdiv(rows, max_block_rows)
    # Always split the row-blocks across 2 TensorCores when there is more than
    # one block (v7x has 2 TCs; on 1-TC chips this is just a serial loop of 2).
    num_cores = 2 if num_blocks >= 2 else 1
    num_blocks = _round_up(num_blocks, num_cores)
    block_rows = _round_up(_cdiv(rows, num_blocks), tile)
    blocks_per_core = num_blocks // num_cores
    rows_padded = num_blocks * block_rows
    pad = rows_padded * _LANES - N

    pm = prior_mean.reshape(-1)
    pls = prior_logstd.reshape(-1)
    qm = post_mean.reshape(-1)
    if pad:
        # Padded elements contribute exactly 0 to the constant-free sum:
        # x = 0 + eps, mu = eps -> diff = 0; logstd = 0 -> u = 0 -> term = 0.
        # (For bf16 inputs the pad constants round, leaving a ~1e-21/element
        # residual - negligible.)
        pm = jnp.pad(pm, (0, pad), constant_values=_EPS)
        pls = jnp.pad(pls, (0, pad), constant_values=0.0)
        qm = jnp.pad(qm, (0, pad), constant_values=0.0)

    pm = pm.reshape(rows_padded, _LANES)
    pls = pls.reshape(rows_padded, _LANES)
    qm = qm.reshape(rows_padded, _LANES)

    # Fold the accumulator in half when it stays sublane-tile aligned (f32 acc).
    acc_rows = block_rows // 2 if (block_rows % 16 == 0) else block_rows

    in_spec = pl.BlockSpec((block_rows, _LANES),
                           lambda p, j: (p * blocks_per_core + j, 0))
    out_spec = pl.BlockSpec((1, 1), lambda p, j: (p, 0),
                            memory_space=pltpu.MemorySpace.SMEM)

    partials = pl.pallas_call(
        _make_kernel(acc_rows, block_rows),
        out_shape=jax.ShapeDtypeStruct((num_cores, 1), jnp.float32),
        grid_spec=pltpu.PrefetchScalarGridSpec(
            num_scalar_prefetch=0,
            grid=(num_cores, blocks_per_core),
            in_specs=[in_spec, in_spec, in_spec],
            out_specs=out_spec,
            scratch_shapes=[pltpu.VMEM((acc_rows, _LANES), jnp.float32)],
        ),
        # TODO(synk): verify in the Mosaic dump that the leading "parallel"
        # axis actually shards across v7x's 2 TensorCores; if it lowers to a
        # serial loop, switch that axis to pltpu.CORE_PARALLEL.
        compiler_params=pltpu.CompilerParams(
            dimension_semantics=("parallel", "arbitrary"),
            # Required on v5e (16 MiB default scoped limit); headroom elsewhere.
            vmem_limit_bytes=48 << 20,
        ),
    )(pm, pls, qm)

    # Kernel accumulates 2x the constant-free log-prob; apply the global 0.5
    # and the hoisted -0.5*log(2*pi) constant (real element count only) here.
    total = 0.5 * jnp.sum(partials) + jnp.float32(-0.5 * _LOG_2PI * N)
    scalar = B * float(math.prod(data_shape))
    return total / jnp.float32(scalar * math.log(2.0))


if __name__ == "__main__":
    key = jax.random.PRNGKey(0)

    def make(shape, dtype, k):
        k1, k2, k3 = jax.random.split(k, 3)
        pm = jax.random.normal(k1, shape, dtype=jnp.float32).astype(dtype)
        pls = (0.1 * jax.random.normal(k2, shape, dtype=jnp.float32)).astype(dtype)
        qm = jax.random.normal(k3, shape, dtype=jnp.float32).astype(dtype)
        return pm, pls, qm

    # 1) Baseline VAE-latent shape (B=2, C=4, 16x16), f32, single block.
    shape = (2, 4, 16, 16)
    pm, pls, qm = make(shape, jnp.float32, jax.random.fold_in(key, 0))
    loss = jax.block_until_ready(
        logprob_kl_divergence(pm, pls, qm, shape[1:], force_pallas=True))
    ref = _reference(pm, pls, qm, shape[1:])
    assert jnp.allclose(loss, ref, rtol=1e-5, atol=1e-5), (loss, ref)

    # 2) Non-lane-divisible shape -> exercises the minimal-padding path.
    shape = (2, 3, 15, 15)
    pm, pls, qm = make(shape, jnp.float32, jax.random.fold_in(key, 1))
    loss = jax.block_until_ready(
        logprob_kl_divergence(pm, pls, qm, shape[1:], force_pallas=True))
    ref = _reference(pm, pls, qm, shape[1:])
    assert jnp.allclose(loss, ref, rtol=1e-5, atol=1e-5), (loss, ref)

    # 3) Multi-block + 2-way core-split path (small data, tiny forced block).
    shape = (2, 4, 32, 32)
    pm, pls, qm = make(shape, jnp.float32, jax.random.fold_in(key, 2))
    loss = jax.block_until_ready(
        logprob_kl_divergence(pm, pls, qm, shape[1:], force_pallas=True,
                              max_block_rows=8))
    ref = _reference(pm, pls, qm, shape[1:])
    assert jnp.allclose(loss, ref, rtol=1e-5, atol=1e-5), (loss, ref)

    # 4) bf16 inputs -> exercises the 16-row sublane tile + in-kernel upcast
    #    and the folded half-block accumulator.
    shape = (2, 4, 16, 16)
    pm, pls, qm = make(shape, jnp.bfloat16, jax.random.fold_in(key, 3))
    loss = jax.block_until_ready(
        logprob_kl_divergence(pm, pls, qm, shape[1:], force_pallas=True))
    ref = _reference(pm, pls, qm, shape[1:])
    assert jnp.allclose(loss, ref, rtol=1e-4, atol=1e-4), (loss, ref)

    # 5) Small-N auto path falls back to the fused XLA reference.
    _ = jax.block_until_ready(logprob_kl_divergence(pm, pls, qm, shape[1:]))

    # TODO(synk): with_stats=True MSE branch not ported (not needed for the default path).
    print("KERNEL_OK")
</pallas_src>

<mosaic_0001>
module attributes {stable_mosaic.version = 11 : i64} {
  func.func @kernel(%arg0: i32, %arg1: i32, %arg2: memref<16x128xf32, #tpu.memory_space<vmem>>, %arg3: memref<16x128xf32, #tpu.memory_space<vmem>>, %arg4: memref<16x128xf32, #tpu.memory_space<vmem>>, %arg5: memref<1x1xf32, #tpu.memory_space<smem>>, %arg6: memref<8x128xf32, #tpu.memory_space<vmem>>) attributes {dimension_semantics = [#tpu.dimension_semantics<parallel>, #tpu.dimension_semantics<arbitrary>], iteration_bounds = array<i64: 1, 1>, scalar_prefetch = 0 : i64, scratch_operands = 1 : i64, tpu.core_type = #tpu.core_type<tc>, window_params = [{transform_indices = @transform_0, window_bounds = array<i64: 16, 128>}, {transform_indices = @transform_1, window_bounds = array<i64: 16, 128>}, {transform_indices = @transform_2, window_bounds = array<i64: 16, 128>}, {transform_indices = @transform_3, window_bounds = array<i64: 1, 1>}]} {
    %c0_i32 = arith.constant 0 : i32
    %0 = arith.cmpi eq, %arg1, %c0_i32 : i32
    %1 = arith.extui %0 : i1 to i32
    %c0_i32_0 = arith.constant 0 : i32
    %2 = arith.cmpi ne, %1, %c0_i32_0 : i32
    scf.if %2 {
      %cst_13 = arith.constant 0.000000e+00 : f32
      %24 = vector.broadcast %cst_13 : f32 to vector<8x128xf32>
      %c0_14 = arith.constant 0 : index
      %c0_15 = arith.constant 0 : index
      %25 = vector.load %arg6[%c0_14, %c0_15] : memref<8x128xf32, #tpu.memory_space<vmem>>, vector<8x128xf32>
      tpu.vector_store %arg6[%c0_14, %c0_15], %24 {strides = array<i32>} : memref<8x128xf32, #tpu.memory_space<vmem>>, vector<8x128xf32>,
    } else {
    }
    %c0 = arith.constant 0 : index
    %c0_1 = arith.constant 0 : index
    %3 = vector.load %arg4[%c0, %c0_1] : memref<16x128xf32, #tpu.memory_space<vmem>>, vector<16x128xf32>
    %cst = arith.constant 9.99999993E-9 : f32
    %4 = vector.broadcast %cst : f32 to vector<16x128xf32>
    %5 = arith.addf %3, %4 : vector<16x128xf32>
    %c0_2 = arith.constant 0 : index
    %c0_3 = arith.constant 0 : index
    %6 = vector.load %arg2[%c0_2, %c0_3] : memref<16x128xf32, #tpu.memory_space<vmem>>, vector<16x128xf32>
    %c0_4 = arith.constant 0 : index
    %c0_5 = arith.constant 0 : index
    %7 = vector.load %arg3[%c0_4, %c0_5] : memref<16x128xf32, #tpu.memory_space<vmem>>, vector<16x128xf32>
    %cst_6 = arith.constant -2.000000e+00 : f32
    %8 = vector.broadcast %cst_6 : f32 to vector<16x128xf32>
    %9 = arith.mulf %8, %7 : vector<16x128xf32>
    %10 = arith.subf %5, %6 : vector<16x128xf32>
    %11 = arith.mulf %10, %10 : vector<16x128xf32>
    %12 = math.exp %9 : vector<16x128xf32>
    %13 = arith.mulf %11, %12 : vector<16x128xf32>
    %14 = arith.subf %9, %13 : vector<16x128xf32>
    %c0_7 = arith.constant 0 : index
    %c0_8 = arith.constant 0 : index
    %15 = vector.load %arg6[%c0_7, %c0_8] : memref<8x128xf32, #tpu.memory_space<vmem>>, vector<8x128xf32>
    %16 = vector.extract_strided_slice %14 {offsets = [0, 0], sizes = [8, 128], strides = [1, 1]} : vector<16x128xf32> to vector<8x128xf32>
    %17 = vector.extract_strided_slice %14 {offsets = [8, 0], sizes = [8, 128], strides = [1, 1]} : vector<16x128xf32> to vector<8x128xf32>
    %18 = arith.addf %16, %17 : vector<8x128xf32>
    %19 = arith.addf %15, %18 : vector<8x128xf32>
    %c0_9 = arith.constant 0 : index
    %c0_10 = arith.constant 0 : index
    %20 = vector.load %arg6[%c0_9, %c0_10] : memref<8x128xf32, #tpu.memory_space<vmem>>, vector<8x128xf32>
    tpu.vector_store %arg6[%c0_9, %c0_10], %19 {strides = array<i32>} : memref<8x128xf32, #tpu.memory_space<vmem>>, vector<8x128xf32>,
    %c0_i32_11 = arith.constant 0 : i32
    %21 = arith.cmpi eq, %arg1, %c0_i32_11 : i32
    %22 = arith.extui %21 : i1 to i32
    %c0_i32_12 = arith.constant 0 : i32
    %23 = arith.cmpi ne, %22, %c0_i32_12 : i32
    scf.if %23 {
      %c0_13 = arith.constant 0 : index
      %c0_14 = arith.constant 0 : index
      %24 = vector.load %arg6[%c0_13, %c0_14] : memref<8x128xf32, #tpu.memory_space<vmem>>, vector<8x128xf32>
      %25 = vector.shape_cast %24 : vector<8x128xf32> to vector<1x8x128xf32>
      %cst_15 = arith.constant dense<0.000000e+00> : vector<1xf32>
      %26 = vector.multi_reduction <add>, %25, %cst_15 [1, 2] : vector<1x8x128xf32> to vector<1xf32>
      %27 = vector.shape_cast %26 : vector<1xf32> to vector<1x1x1xf32>
      %28 = vector.extract %27[0, 0, 0] : f32 from vector<1x1x1xf32>
      %c0_16 = arith.constant 0 : index
      %c0_17 = arith.constant 0 : index
      %29 = memref.load %arg5[%c0_16, %c0_17] : memref<1x1xf32, #tpu.memory_space<smem>>
      memref.store %28, %arg5[%c0_16, %c0_17] : memref<1x1xf32, #tpu.memory_space<smem>>
    } else {
    }
    return
  }
  func.func @transform_0(%arg0: i32, %arg1: i32) -> (i32, i32) {
    %c1_i32 = arith.constant 1 : i32
    %0 = arith.muli %arg0, %c1_i32 : i32
    %1 = arith.addi %0, %arg1 : i32
    %c0_i32 = arith.constant 0 : i32
    %c0_i32_0 = arith.constant 0 : i32
    return %1, %c0_i32 : i32, i32
  }
  func.func @transform_1(%arg0: i32, %arg1: i32) -> (i32, i32) {
    %c1_i32 = arith.constant 1 : i32
    %0 = arith.muli %arg0, %c1_i32 : i32
    %1 = arith.addi %0, %arg1 : i32
    %c0_i32 = arith.constant 0 : i32
    %c0_i32_0 = arith.constant 0 : i32
    return %1, %c0_i32 : i32, i32
  }
  func.func @transform_2(%arg0: i32, %arg1: i32) -> (i32, i32) {
    %c1_i32 = arith.constant 1 : i32
    %0 = arith.muli %arg0, %c1_i32 : i32
    %1 = arith.addi %0, %arg1 : i32
    %c0_i32 = arith.constant 0 : i32
    %c0_i32_0 = arith.constant 0 : i32
    return %1, %c0_i32 : i32, i32
  }
  func.func @transform_3(%arg0: i32, %arg1: i32) -> (i32, i32) {
    %c0_i32 = arith.constant 0 : i32
    %c0_i32_0 = arith.constant 0 : i32
    return %arg0, %c0_i32 : i32, i32
  }
}

</mosaic_0001>

<bundles_post_ra>
// kernel: tpu_custom_call.1
= control target key start
LH: loop header
LB: loop body
LE: loop exit
PB: predicated region body
PF: predicated region fallthrough
CT: control target
= control target key end

     0   :  { %8 = vsyncpa [#allocation4], 0  ;;  %s259_s0 = inlined_call_operand.hbm [shape: f32[16,128], index: 0, kind: input, shape index: {}]   ;;  %s260_s1 = inlined_call_operand.hbm [shape: f32[16,128], index: 1, kind: input, shape index: {}]   ;;  %s261_s2 = inlined_call_operand.hbm [shape: f32[16,128], index: 2, kind: input, shape index: {}]   ;;  %s262_s3 = inlined_call_operand.hbm [shape: f32[1,1], index: 3, kind: output, shape index: {}]  }
   0x1   :  { %9 = vsyncpa [#allocation7], 0 }
   0x2   :  { %10 = vsyncpa [#allocation5], 0  ;;  %s221_s12 = smov [#allocation6]   ;;  %s222_s14 = smov [#allocation3]  }
   0x3   :  { %s36_s13 = sshll.u32 %s221_s12, 4  ;;  %s20_s15 = sshll.u32 %s222_s14, 4  ;;  %s37_s13 = int_to_ptr.vmem [resolvable:$true] %s36_s13  ;;  %s21_s15 = int_to_ptr.vmem [resolvable:$true] %s20_s15 }
   0x4   :  { %s155_s16 = scalar_lea.vmem %s37_s13, 256  ;;  %p160_p1 = scmp.lt.s32.totalorder %s37_s13, %s37_s13 }
   0x5   :  { %p156_p0 = scmp.ne.s32.totalorder %s37_s13, %s155_s16  ;;  %p161_p2 = scmp.lt.s32.totalorder %s155_s16, %s155_s16 }
   0x7   :  { %p162_p3 = por %p161_p2, %p160_p1 }
   0x9   :  { %p163_p4 = pnand %p162_p3, %p156_p0 }
   0xb   :  { %166 = shalt.err (!%p163_p4)
}
   0xc   :  { %s223_s17 = smov 128   ;;  %s224_s18 = smov 8  }
   0xd   :  { %42 = dma.hbm_to_vmem [thread:$0]  %s260_s1, 256, %s37_s13, [#allocation7], %s223_s17, %s223_s17, %s224_s18  }
   0xe   :  { %s175_s21 = scalar_lea.vmem %s21_s15, 256  ;;  %p180_p6 = scmp.lt.s32.totalorder %s21_s15, %s21_s15 }
   0xf   :  { %p176_p5 = scmp.ne.s32.totalorder %s21_s15, %s175_s21  ;;  %p181_p7 = scmp.lt.s32.totalorder %s175_s21, %s175_s21 }
  0x11   :  { %p182_p8 = por %p181_p7, %p180_p6 }
  0x13   :  { %p183_p9 = pnand %p182_p8, %p176_p5 }
  0x15   :  { %186 = shalt.err (!%p183_p9)
}
  0x16   :  { %26 = dma.hbm_to_vmem [thread:$0]  %s259_s0, 256, %s21_s15, [#allocation4], %s223_s17, %s223_s17, %s224_s18  }
  0x17   :  { %s225_s24 = smov [#allocation8]  }
  0x18   :  { %s52_s25 = sshll.u32 %s225_s24, 4  ;;  %s53_s25 = int_to_ptr.vmem [resolvable:$true] %s52_s25 }
  0x19   :  { %s195_s26 = scalar_lea.vmem %s53_s25, 256  ;;  %p200_p11 = scmp.lt.s32.totalorder %s53_s25, %s53_s25 }
  0x1a   :  { %p196_p10 = scmp.ne.s32.totalorder %s53_s25, %s195_s26  ;;  %p201_p12 = scmp.lt.s32.totalorder %s195_s26, %s195_s26 }
  0x1c   :  { %p202_p13 = por %p201_p12, %p200_p11 }
  0x1e   :  { %p203_p0 = pnand %p202_p13, %p196_p10 }
  0x20   :  { %206 = shalt.err (!%p203_p0)
}
  0x21   :  { %58 = dma.hbm_to_vmem [thread:$0]  %s261_s2, 256, %s53_s25, [#allocation7], %s223_s17, %s223_s17, %s224_s18  }
  0x22   :  { %215 = dma.done.wait [#allocation4], 256  }
  0x23   :  { %216 = vsyncadd [#allocation4], 4294967040 }
  0x24   :  { %217 = dma.done.wait [#allocation7], 512  }
  0x25   :  { %218 = vsyncadd [#allocation7], 4294966784  ;;  %v85_v0 = vld [vmem:[#allocation6] sm:$0xff]  ;;  %v86_v1 = vld [vmem:[#allocation6 + $0x8] sm:$0xff]  ;;  %s226_s2 = smov [#allocation9]  }
  0x26   :  { %v87_v2 = vmul.f32 -2.0, %v85_v0  ;;  %v88_v3 = vmul.f32 -2.0, %v86_v1  ;;  %v79_v5 = vld [vmem:[#allocation8] sm:$0xff]  ;;  %v80_v7 = vld [vmem:[#allocation8 + $0x8] sm:$0xff] }
  0x27   :  { %v81_v8 = vadd.f32 1e-08, %v79_v5  ;;  %v82_v9 = vadd.f32 1e-08, %v80_v7  ;;  %v83_v10 = vld [vmem:[#allocation3] sm:$0xff]  ;;  %v84_v11 = vld [vmem:[#allocation3 + $0x8] sm:$0xff] }
  0x28   :  { %v93_v4 = vmul.f32 1.442695, %v87_v2  ;;  %v95_v6 = vmul.f32 1.442695, %v88_v3 }
  0x29   :  { %v89_v12 = vsub.f32 %v81_v8, %v83_v10  ;;  %v90_v13 = vsub.f32 %v82_v9, %v84_v11 }
  0x2a   :  { %143 = vpow2.f32 %v93_v4 }
  0x2b   :  { %145 = vpow2.f32 %v95_v6  ;;  %v91_v14 = vmul.f32 %v89_v12, %v89_v12  ;;  %v92_v15 = vmul.f32 %v90_v13, %v90_v13 }
  0x37   :  { %v144_v16 = vpop.eup %143 }
  0x38   :  { %v146_v17 = vpop.eup %145  ;;  %v97_v18 = vmul.f32 %v144_v16, %v91_v14 }
  0x39   :  { %v98_v19 = vmul.f32 %v146_v17, %v92_v15 }
  0x3a   :  { %v99_v20 = vsub.f32 %v87_v2, %v97_v18 }
  0x3b   :  { %v100_v21 = vsub.f32 %v88_v3, %v98_v19 }
  0x3d   :  { %v102_v22 = vadd.f32 %v100_v21, %v99_v20 }
  0x3f   :  { %109 = vadd.xlane.f32.xlu0 %v102_v22 }
  0xc8   :  { %v110_v23 = vpop.xlane.xlu0 %109 }
  0xc9   :  { %v111_v24 = vrot.slane %v110_v23, 4 }
  0xcb   :  { %v112_v25 = vadd.f32 %v111_v24, %v110_v23 }
  0xcd   :  { %v113_v26 = vrot.slane %v112_v25, 2 }
  0xcf   :  { %v114_v27 = vadd.f32 %v113_v26, %v112_v25 }
  0xd1   :  { %v115_v28 = vrot.slane %v114_v27, 1 }
  0xd3   :  { %v116_v29 = vadd.f32 %v115_v28, %v114_v27 }
  0xd5   :  { %135 = vpush %v116_v29 }
 0x106   :  { %s136_s0 = spop %135 }
 0x107   :  { %119 = sst [smem:[#allocation9]] %s136_s0 }
 0x108   :  { %127 = dma.smem_to_hbm %s226_s2, 16, %s262_s3, [#allocation5]  }
 0x109   :  { %219 = dma.done.wait [#allocation5], 16  }
 0x10a   :  { %220 = vsyncadd [#allocation5], 4294967280 }
 0x10b   :  { %131 = sfence }
 0x10c   :  { %132 = vsyncpa [#allocation4], 1 }
 0x10d   :  { %133 = vsyncpa [#allocation7], 1 }
 0x10e   :  { %134 = vsyncpa [#allocation5], 1 }

</bundles_post_ra>
